<compile_context>
chip_gen: v5e
topology: v5e:2x2
jax: 0.10.0
libtpu: 0.0.40
codegen_flags: <defaults>
</compile_context>

<pallas_src>
import functools

import jax
import jax.numpy as jnp
from jax.experimental import pallas as pl
from jax.experimental.pallas import tpu as pltpu


# ---------------------------------------------------------------------------
# Small helpers
# ---------------------------------------------------------------------------
def _round_up(v, m):
    return ((v + m - 1) // m) * m


def _tpu_vmem_bytes():
    try:
        return int(pltpu.get_tpu_info().vmem_capacity_bytes)
    except Exception:
        return 64 * 1024 * 1024          # conservative fallback (v7x per-core VMEM)


def _num_tensorcores():
    # Only v7x parts have 2 TensorCores per chip; on v5e/v6e a batch-shard grid
    # axis is just a serial loop (pure overhead), so keep it un-split there.
    try:
        kind = jax.devices()[0].device_kind.lower()
    except Exception:
        return 1
    return 2 if ("v7" in kind or "tpu7" in kind) else 1


def _prescale_gates(w, h):
    """Scale the i/f/o gate columns by 0.5 (g columns untouched) so that
    sigmoid(z) == 0.5*(tanh(z_prescaled)+1) needs no inner 0.5*z multiply
    inside the serial recurrence loop.  Exact in bf16 (power-of-two scale)."""
    scale = jnp.concatenate([
        jnp.full((h,), 0.5, jnp.float32),
        jnp.full((h,), 0.5, jnp.float32),
        jnp.ones((h,), jnp.float32),
        jnp.full((h,), 0.5, jnp.float32)])
    return w.astype(jnp.float32) * scale


def _pad_gate_cols(w, h, hp):
    """(R, 4h) -> (R, 4hp): zero-pad each gate block separately so the four
    gate slices stay 128-lane aligned inside the kernel."""
    if hp == h:
        return w.astype(jnp.float32)
    parts = [jnp.pad(w[:, g * h:(g + 1) * h], ((0, 0), (0, hp - h)))
             for g in range(4)]
    return jnp.concatenate(parts, axis=1).astype(jnp.float32)


# ---------------------------------------------------------------------------
# Row-tiled matmul-with-bias kernel (used only for the tiny per-sequence
# properties gate-bias GEMM: (Bp, P) @ (P, 4Hp) + b).
# ---------------------------------------------------------------------------
def _matmul_bias_kernel(a_ref, b_ref, bias_ref, o_ref, *, mxu_dtype):
    o_ref[...] = (jnp.dot(a_ref[...].astype(mxu_dtype), b_ref[...],
                          preferred_element_type=jnp.float32)
                  + bias_ref[...])


def _pick_row_tile(m, k, n, bytes_mxu, budget, cap=512):
    per_row = 2 * (k * bytes_mxu + n * 4)          # double-buffered a-row + out-row
    fixed = 2 * (k * n * bytes_mxu + n * 4)        # resident weights + bias
    avail = max(budget - fixed, 8 * per_row)
    tm = (avail // per_row) // 8 * 8
    tm = int(max(8, min(cap, tm)))
    return int(min(tm, _round_up(m, 8)))


def matmul_bias(a, b, bias, *, mxu_dtype, budget, vmem_limit):
    """(M, K) @ (K, N) + bias(1, N) -> f32 (M, N); rows padded up to the tile
    (never degrade to tiny tiles)."""
    m, k = a.shape
    n = b.shape[1]
    tm = _pick_row_tile(m, k, n, jnp.dtype(mxu_dtype).itemsize, budget)
    mp = _round_up(m, tm)
    a_p = jnp.pad(a, ((0, mp - m), (0, 0))) if mp != m else a
    kern = functools.partial(_matmul_bias_kernel, mxu_dtype=mxu_dtype)
    out = pl.pallas_call(
        kern,
        out_shape=jax.ShapeDtypeStruct((mp, n), jnp.float32),
        grid_spec=pltpu.PrefetchScalarGridSpec(
            num_scalar_prefetch=0,
            grid=(mp // tm,),
            in_specs=[
                pl.BlockSpec((tm, k), lambda i: (i, 0)),
                pl.BlockSpec((k, n), lambda i: (0, 0)),
                pl.BlockSpec((1, n), lambda i: (0, 0)),
            ],
            out_specs=pl.BlockSpec((tm, n), lambda i: (i, 0)),
        ),
        compiler_params=pltpu.CompilerParams(
            dimension_semantics=("parallel",),
            vmem_limit_bytes=vmem_limit),
    )(a_p.astype(mxu_dtype), b.astype(mxu_dtype), bias.astype(jnp.float32))
    return out[:m] if mp != m else out


# ---------------------------------------------------------------------------
# One LSTM layer: fused input projection per time block + sequential recurrence.
# ---------------------------------------------------------------------------
def _make_lstm_layer_kernel(Hp, TB, mxu_dtype):
    def kernel(x_ref, wih_ref, whh_ref, gb_ref, h0_ref, c0_ref,
               out_ref, hN_ref, cN_ref, h_s, c_s):
        t_blk = pl.program_id(1)

        @pl.when(t_blk == 0)
        def _init():
            h_s[...] = h0_ref[...]
            c_s[...] = c0_ref[...]

        Bs = x_ref.shape[1]
        # Fused input projection for the whole time block: one
        # (TB*Bs, Hp) @ (Hp, 4Hp) MXU matmul, off the serial recurrence path.
        # The per-row gate bias (layer-0 property term + LSTM biases) is
        # folded in here once, not re-added every timestep.
        x2d = x_ref[...].reshape(TB * Bs, Hp)
        xg = jnp.dot(x2d, wih_ref[...], preferred_element_type=jnp.float32)
        xg = xg.reshape(TB, Bs, 4 * Hp) + gb_ref[...]

        w_hh = whh_ref[...]
        # TODO(synk): hold w_hh stationary in the MXU across the unrolled steps
        #             via pltpu.matmul_push_rhs / matmul_acc_lhs / matmul_pop.
        for tt in range(TB):
            gates = xg[tt] + jnp.dot(h_s[...].astype(mxu_dtype), w_hh,
                                     preferred_element_type=jnp.float32)
            # i/f/o weight/bias columns are pre-scaled by 0.5 offline, so
            # sigmoid(z) == 0.5*(tanh(z')+1) with no inner multiply here.
            i_g = 0.5 * (jnp.tanh(gates[:, 0 * Hp:1 * Hp]) + 1.0)
            f_g = 0.5 * (jnp.tanh(gates[:, 1 * Hp:2 * Hp]) + 1.0)
            g_g = jnp.tanh(gates[:, 2 * Hp:3 * Hp])
            o_g = 0.5 * (jnp.tanh(gates[:, 3 * Hp:4 * Hp]) + 1.0)
            c_new = f_g * c_s[...] + i_g * g_g
            h_new = o_g * jnp.tanh(c_new)
            h_s[...] = h_new
            c_s[...] = c_new
            out_ref[tt] = h_new.astype(out_ref.dtype)

        @pl.when(t_blk == pl.num_programs(1) - 1)
        def _fin():
            hN_ref[...] = h_s[...]
            cN_ref[...] = c_s[...]

    return kernel


def _pick_time_block(T, Bs, Hp, bytes_mxu, bytes_seq, budget, cap=32):
    best = 1
    for tb in range(1, min(T, cap) + 1):
        if T % tb:
            continue
        need = (2 * tb * Bs * Hp * (bytes_mxu + bytes_seq)    # in + out blocks (dbl-buf)
                + tb * Bs * 4 * Hp * 4                        # in-kernel f32 xg value
                + 2 * 2 * Hp * 4 * Hp * bytes_mxu             # w_ih + w_hh
                + 2 * Bs * 4 * Hp * 4                         # gate bias
                + 6 * Bs * Hp * 4)                            # h0/c0 + h/c scratch
        if need <= budget:
            best = tb
    return best


def lstm_layer(x_seq, w_ih, w_hh, gb, h0, c0, *, tb, b_shards, mxu_dtype,
               seq_dtype, vmem_limit):
    """x_seq: (T, Bp, Hp) time-major layer input; returns (out_seq, h_N, c_N)."""
    T, Bp, Hp = x_seq.shape
    G = 4 * Hp
    Bs = Bp // b_shards
    kern = _make_lstm_layer_kernel(Hp, tb, mxu_dtype)
    return pl.pallas_call(
        kern,
        out_shape=(
            jax.ShapeDtypeStruct((T, Bp, Hp), seq_dtype),
            jax.ShapeDtypeStruct((Bp, Hp), jnp.float32),
            jax.ShapeDtypeStruct((Bp, Hp), jnp.float32),
        ),
        grid_spec=pltpu.PrefetchScalarGridSpec(
            num_scalar_prefetch=0,
            grid=(b_shards, T // tb),
            in_specs=[
                pl.BlockSpec((tb, Bs, Hp), lambda b, t: (t, b, 0)),
                pl.BlockSpec((Hp, G), lambda b, t: (0, 0)),
                pl.BlockSpec((Hp, G), lambda b, t: (0, 0)),
                pl.BlockSpec((Bs, G), lambda b, t: (b, 0)),
                pl.BlockSpec((Bs, Hp), lambda b, t: (b, 0)),
                pl.BlockSpec((Bs, Hp), lambda b, t: (b, 0)),
            ],
            out_specs=[
                pl.BlockSpec((tb, Bs, Hp), lambda b, t: (t, b, 0)),
                pl.BlockSpec((Bs, Hp), lambda b, t: (b, 0)),
                pl.BlockSpec((Bs, Hp), lambda b, t: (b, 0)),
            ],
            scratch_shapes=[
                pltpu.VMEM((Bs, Hp), jnp.float32),   # h state
                pltpu.VMEM((Bs, Hp), jnp.float32),   # c state
            ],
        ),
        compiler_params=pltpu.CompilerParams(
            # batch shards are independent (v7x 2 TCs); recurrence over time.
            dimension_semantics=("parallel", "arbitrary"),
            vmem_limit_bytes=vmem_limit),
    )(x_seq.astype(mxu_dtype), w_ih.astype(mxu_dtype), w_hh.astype(mxu_dtype),
      gb.astype(jnp.float32), h0.astype(jnp.float32), c0.astype(jnp.float32))


# ---------------------------------------------------------------------------
# Decoder: batch-first, lane-dense logits written directly by the kernel.
# ---------------------------------------------------------------------------
def _decoder_kernel(x_ref, w_ref, b_ref, o_ref, *, mxu_dtype):
    bs, tb, Hp = x_ref.shape
    y = jnp.dot(x_ref[...].astype(mxu_dtype).reshape(bs * tb, Hp), w_ref[...],
                preferred_element_type=jnp.float32) + b_ref[...]
    o_ref[...] = y.reshape(bs, tb, -1)          # dense (bs, tb, Op) block store


def _pick_decoder_tiles(T, Bp, Hp, Op, bytes_mxu, budget, bs_cap=64, tb_cap=128):
    tb_cands = [d for d in range(1, min(T, tb_cap) + 1)
                if T % d == 0 and (d % 8 == 0 or d == T)]
    if not tb_cands:
        tb_cands = [T]
    bs_cands = [d for d in range(8, min(Bp, bs_cap) + 1, 8) if Bp % d == 0]
    if not bs_cands:
        bs_cands = [Bp]
    fixed = 2 * (Hp * Op * bytes_mxu + Op * 4)
    best = (bs_cands[0], tb_cands[0])
    for bs in bs_cands:
        for tb in tb_cands:
            need = fixed + 2 * bs * tb * (Hp * bytes_mxu + Op * 4)
            if need <= budget and bs * tb > best[0] * best[1]:
                best = (bs, tb)
    return best


def decoder_batch_first(x_bf, w, bias, *, bs, tb, mxu_dtype, vmem_limit):
    """x_bf: (Bp, T, Hp) batch-first hidden sequence -> (Bp, T, Op) f32 logits."""
    Bp, T, Hp = x_bf.shape
    Op = w.shape[1]
    kern = functools.partial(_decoder_kernel, mxu_dtype=mxu_dtype)
    return pl.pallas_call(
        kern,
        out_shape=jax.ShapeDtypeStruct((Bp, T, Op), jnp.float32),
        grid_spec=pltpu.PrefetchScalarGridSpec(
            num_scalar_prefetch=0,
            grid=(Bp // bs, T // tb),
            in_specs=[
                pl.BlockSpec((bs, tb, Hp), lambda b, t: (b, t, 0)),
                pl.BlockSpec((Hp, Op), lambda b, t: (0, 0)),
                pl.BlockSpec((1, Op), lambda b, t: (0, 0)),
            ],
            out_specs=pl.BlockSpec((bs, tb, Op), lambda b, t: (b, t, 0)),
        ),
        compiler_params=pltpu.CompilerParams(
            dimension_semantics=("parallel", "parallel"),
            vmem_limit_bytes=vmem_limit),
    )(x_bf.astype(mxu_dtype), w.astype(mxu_dtype), bias.astype(jnp.float32))


# ---------------------------------------------------------------------------
# Full forward
# ---------------------------------------------------------------------------
def conditional_smiles_rnn_forward(x, properties, hidden, params, *,
                                   mxu_dtype=jnp.bfloat16):
    """x: (B, T) int32; properties: (B, P) f32; hidden = (h0, c0), each (L, B, H)."""
    h0, c0 = hidden
    L, B, H = h0.shape
    T = x.shape[1]
    O = params["decoder_w"].shape[1]

    Hp = _round_up(H, 128)        # 128-lane-aligned gate blocks / hidden state
    Op = _round_up(O, 128)        # lane-dense decoder output
    Bp = _round_up(B, 8)          # full f32 sublane utilization
    pad_b = Bp - B

    bytes_mxu = jnp.dtype(mxu_dtype).itemsize
    seq_dtype = mxu_dtype         # inter-layer sequence storage dtype

    phys_vmem = _tpu_vmem_bytes()
    budget = int(phys_vmem * 0.4)            # per-kernel block/double-buffer budget
    vmem_limit = int(phys_vmem * 0.85)

    n_tc = _num_tensorcores()
    b_shards = n_tc if (n_tc > 1 and Bp % (8 * n_tc) == 0) else 1
    Bs = Bp // b_shards

    # --- one-time weight prep: 0.5 prescale on i/f/o gates, per-gate Hp pad ---
    layer_w = []
    for l in range(L):
        w_ih = _pad_gate_cols(_prescale_gates(params[f"w_ih_{l}"], H), H, Hp)
        w_hh = _pad_gate_cols(_prescale_gates(params[f"w_hh_{l}"], H), H, Hp)
        b_l = _pad_gate_cols(_prescale_gates(params[f"b_{l}"], H), H, Hp)
        w_hh = jnp.pad(w_hh, ((0, Hp - H), (0, 0)))               # (Hp, 4Hp)
        if l == 0:
            w_ih_x = jnp.pad(w_ih[:H], ((0, Hp - H), (0, 0)))     # (Hp, 4Hp)
            w_ih_p = w_ih[H:]                                     # (P, 4Hp)
        else:
            w_ih_x = jnp.pad(w_ih, ((0, Hp - H), (0, 0)))
            w_ih_p = None
        layer_w.append((w_ih_x.astype(mxu_dtype), w_ih_p,
                        w_hh.astype(mxu_dtype), b_l.astype(jnp.float32)))

    # --- glue: time-major embedding gather (no HBM transpose of embeds), pads ---
    enc_p = jnp.pad(params["encoder"].astype(jnp.float32),
                    ((0, 0), (0, Hp - H))).astype(mxu_dtype)
    emb_tm = jnp.take(enc_p, x.T, axis=0)                         # (T, B, Hp)
    emb_tm = jnp.pad(emb_tm, ((0, 0), (0, pad_b), (0, 0)))        # (T, Bp, Hp)
    props_p = jnp.pad(properties.astype(jnp.float32), ((0, pad_b), (0, 0)))
    h0_p = jnp.pad(h0.astype(jnp.float32), ((0, 0), (0, pad_b), (0, Hp - H)))
    c0_p = jnp.pad(c0.astype(jnp.float32), ((0, 0), (0, pad_b), (0, Hp - H)))

    tb = _pick_time_block(T, Bs, Hp, bytes_mxu,
                          jnp.dtype(seq_dtype).itemsize, budget)

    layer_in = emb_tm                                             # (T, Bp, Hp) mxu dtype
    h_fin, c_fin = [], []
    for l in range(L):
        w_ih_x, w_ih_p, w_hh, b_l = layer_w[l]
        if l == 0:
            # Time-invariant property contribution, folded into a per-row gate bias.
            gb = matmul_bias(props_p.astype(mxu_dtype), w_ih_p, b_l,
                             mxu_dtype=mxu_dtype, budget=budget,
                             vmem_limit=vmem_limit)               # (Bp, 4Hp) f32
        else:
            gb = jnp.broadcast_to(b_l, (Bp, 4 * Hp))
        out_seq, hN, cN = lstm_layer(layer_in, w_ih_x, w_hh, gb,
                                     h0_p[l], c0_p[l],
                                     tb=tb, b_shards=b_shards,
                                     mxu_dtype=mxu_dtype, seq_dtype=seq_dtype,
                                     vmem_limit=vmem_limit)
        # TODO(synk): recurrent dropout between layers (train-only) omitted.
        layer_in = out_seq
        h_fin.append(hN)
        c_fin.append(cN)

    # --- decoder: one cheap bf16 hidden-seq transpose in the wrapper, then the
    #     kernel writes batch-first f32 logits directly (no logits transpose). ---
    dec_in = jnp.transpose(layer_in, (1, 0, 2))                   # (Bp, T, Hp)
    dec_w = jnp.pad(params["decoder_w"], ((0, Hp - H), (0, Op - O)))
    dec_b = jnp.pad(params["decoder_b"], ((0, 0), (0, Op - O)))
    bs_dec, tb_dec = _pick_decoder_tiles(T, Bp, Hp, Op, bytes_mxu, budget)
    logits = decoder_batch_first(dec_in, dec_w, dec_b, bs=bs_dec, tb=tb_dec,
                                 mxu_dtype=mxu_dtype, vmem_limit=vmem_limit)

    output = logits[:B, :, :O]                                    # (B, T, O)
    h_out = jnp.stack(h_fin)[:, :B, :H]
    c_out = jnp.stack(c_fin)[:, :B, :H]
    return output, (h_out, c_out)


# ---------------------------------------------------------------------------
# Synthetic parameters + pure-JAX reference
# ---------------------------------------------------------------------------
def init_params(key, input_size, property_size, hidden_size, output_size, n_layers):
    H = hidden_size
    keys = jax.random.split(key, 2 + 2 * n_layers)
    params = {}

    def xavier_uniform(k, shape):
        fan_in, fan_out = shape[0], shape[1]
        limit = (6.0 / (fan_in + fan_out)) ** 0.5
        return jax.random.uniform(k, shape, jnp.float32, -limit, limit)

    params["encoder"] = xavier_uniform(keys[0], (input_size, H))
    params["decoder_w"] = xavier_uniform(keys[1], (H, output_size))
    params["decoder_b"] = jnp.zeros((1, output_size), jnp.float32)

    for l in range(n_layers):
        in_dim = H + property_size if l == 0 else H
        params[f"w_ih_{l}"] = 0.1 * jax.random.normal(
            keys[2 + 2 * l], (in_dim, 4 * H), jnp.float32)
        params[f"w_hh_{l}"] = 0.1 * jax.random.normal(
            keys[3 + 2 * l], (H, 4 * H), jnp.float32)
        # b = b_ih + b_hh; both forget-gate segments [H:2H] set to 1 -> combined 2.
        b = jnp.zeros((1, 4 * H), jnp.float32)
        b = b.at[:, H:2 * H].set(2.0)
        params[f"b_{l}"] = b
    return params


def reference_forward(x, properties, hidden, params):
    h0, c0 = hidden
    emb = jnp.take(params["encoder"], x, axis=0)
    B, T, H = emb.shape
    props = jnp.broadcast_to(properties[:, None, :], (B, T, properties.shape[1]))
    xp = jnp.concatenate([emb, props], axis=-1).astype(jnp.float32)
    L = h0.shape[0]
    h = [h0[l] for l in range(L)]
    c = [c0[l] for l in range(L)]
    outs = []
    for t in range(T):
        inp = xp[:, t, :]
        for l in range(L):
            gates = (inp @ params[f"w_ih_{l}"] + h[l] @ params[f"w_hh_{l}"]
                     + params[f"b_{l}"][0])
            i_g = jax.nn.sigmoid(gates[:, :H])
            f_g = jax.nn.sigmoid(gates[:, H:2 * H])
            g_g = jnp.tanh(gates[:, 2 * H:3 * H])
            o_g = jax.nn.sigmoid(gates[:, 3 * H:4 * H])
            c[l] = f_g * c[l] + i_g * g_g
            h[l] = o_g * jnp.tanh(c[l])
            inp = h[l]
        outs.append(inp @ params["decoder_w"] + params["decoder_b"][0])
    return jnp.stack(outs, axis=1), (jnp.stack(h), jnp.stack(c))


if __name__ == "__main__":
    input_size = 16     # vocab
    property_size = 4
    hidden_size = 32
    output_size = 16
    n_layers = 2
    B, T = 2, 8

    key = jax.random.PRNGKey(0)
    k_par, k_x, k_p = jax.random.split(key, 3)

    params = init_params(k_par, input_size, property_size, hidden_size,
                         output_size, n_layers)
    x = jax.random.randint(k_x, (B, T), 0, input_size, dtype=jnp.int32)
    properties = jax.random.normal(k_p, (B, property_size), jnp.float32)
    h0 = jnp.zeros((n_layers, B, hidden_size), jnp.float32)
    c0 = jnp.zeros((n_layers, B, hidden_size), jnp.float32)

    ref_out, (ref_h, ref_c) = reference_forward(x, properties, (h0, c0), params)

    # (1) f32-MXU path: tight correctness check against the reference.
    out32, (h32, c32) = conditional_smiles_rnn_forward(
        x, properties, (h0, c0), params, mxu_dtype=jnp.float32)
    out32 = jax.block_until_ready(out32)
    h32 = jax.block_until_ready(h32)
    c32 = jax.block_until_ready(c32)
    assert out32.shape == (B, T, output_size)
    assert h32.shape == (n_layers, B, hidden_size)
    assert c32.shape == (n_layers, B, hidden_size)
    assert jnp.allclose(out32, ref_out, atol=1e-4), "logits mismatch (f32)"
    assert jnp.allclose(h32, ref_h, atol=1e-4), "h_n mismatch (f32)"
    assert jnp.allclose(c32, ref_c, atol=1e-4), "c_n mismatch (f32)"

    # (2) default bf16 streaming/MXU path (production perf path): sanity check.
    out16, (h16, c16) = conditional_smiles_rnn_forward(
        x, properties, (h0, c0), params)
    out16 = jax.block_until_ready(out16)
    h16 = jax.block_until_ready(h16)
    c16 = jax.block_until_ready(c16)
    assert jnp.allclose(out16, ref_out, atol=7.5e-2), "logits mismatch (bf16)"
    assert jnp.allclose(h16, ref_h, atol=7.5e-2), "h_n mismatch (bf16)"
    assert jnp.allclose(c16, ref_c, atol=7.5e-2), "c_n mismatch (bf16)"

    print("KERNEL_OK")
</pallas_src>

<mosaic_0001>
module attributes {stable_mosaic.version = 11 : i64} {
  func.func @_matmul_bias_kernel(%arg0: i32, %arg1: memref<8x4xf32, #tpu.memory_space<vmem>>, %arg2: memref<4x512xf32, #tpu.memory_space<vmem>>, %arg3: memref<1x512xf32, #tpu.memory_space<vmem>>, %arg4: memref<8x512xf32, #tpu.memory_space<vmem>>) attributes {dimension_semantics = [#tpu.dimension_semantics<parallel>], iteration_bounds = array<i64: 1>, scalar_prefetch = 0 : i64, scratch_operands = 0 : i64, tpu.core_type = #tpu.core_type<tc>, window_params = [{transform_indices = @transform_0, window_bounds = array<i64: 8, 4>}, {pipeline_mode = #tpu.pipeline_mode<synchronous>, transform_indices = @transform_1, window_bounds = array<i64: 4, 512>}, {pipeline_mode = #tpu.pipeline_mode<synchronous>, transform_indices = @transform_2, window_bounds = array<i64: 1, 512>}, {transform_indices = @transform_3, window_bounds = array<i64: 8, 512>}]} {
    %c0 = arith.constant 0 : index
    %c0_0 = arith.constant 0 : index
    %0 = vector.load %arg1[%c0, %c0_0] : memref<8x4xf32, #tpu.memory_space<vmem>>, vector<8x4xf32>
    %c0_1 = arith.constant 0 : index
    %c0_2 = arith.constant 0 : index
    %1 = vector.load %arg2[%c0_1, %c0_2] : memref<4x512xf32, #tpu.memory_space<vmem>>, vector<4x512xf32>
    %cst = arith.constant dense<0.000000e+00> : vector<8x512xf32>
    %2 = tpu.matmul %0, %1, %cst {dimension_numbers = #tpu.dot_dimension_numbers<[1], [0], [0], [1], [0, 0, 1, 1], [], []>} : vector<8x4xf32>, vector<4x512xf32>, vector<8x512xf32> -> vector<8x512xf32>
    %c0_3 = arith.constant 0 : index
    %c0_4 = arith.constant 0 : index
    %3 = vector.load %arg3[%c0_3, %c0_4] : memref<1x512xf32, #tpu.memory_space<vmem>>, vector<1x512xf32>
    %4 = vector.broadcast %3 : vector<1x512xf32> to vector<8x512xf32>
    %5 = arith.addf %2, %4 : vector<8x512xf32>
    %c0_5 = arith.constant 0 : index
    %c0_6 = arith.constant 0 : index
    %6 = vector.load %arg4[%c0_5, %c0_6] : memref<8x512xf32, #tpu.memory_space<vmem>>, vector<8x512xf32>
    tpu.vector_store %arg4[%c0_5, %c0_6], %5 {strides = array<i32>} : memref<8x512xf32, #tpu.memory_space<vmem>>, vector<8x512xf32>,
    return
  }
  func.func @transform_0(%arg0: i32) -> (i32, i32) {
    %c0_i32 = arith.constant 0 : i32
    %c0_i32_0 = arith.constant 0 : i32
    return %arg0, %c0_i32 : i32, i32
  }
  func.func @transform_1(%arg0: i32) -> (i32, i32) {
    %c0_i32 = arith.constant 0 : i32
    %c0_i32_0 = arith.constant 0 : i32
    %c0_i32_1 = arith.constant 0 : i32
    return %c0_i32, %c0_i32_0 : i32, i32
  }
  func.func @transform_2(%arg0: i32) -> (i32, i32) {
    %c0_i32 = arith.constant 0 : i32
    %c0_i32_0 = arith.constant 0 : i32
    %c0_i32_1 = arith.constant 0 : i32
    return %c0_i32, %c0_i32_0 : i32, i32
  }
  func.func @transform_3(%arg0: i32) -> (i32, i32) {
    %c0_i32 = arith.constant 0 : i32
    %c0_i32_0 = arith.constant 0 : i32
    return %arg0, %c0_i32 : i32, i32
  }
}

</mosaic_0001>

<bundles_post_ra>
// kernel: tpu_custom_call.1
= control target key start
LH: loop header
LB: loop body
LE: loop exit
PB: predicated region body
PF: predicated region fallthrough
CT: control target
= control target key end

     0   :  { %8 = vsyncpa [#allocation3], 0  ;;  %s261_s0 = inlined_call_operand.vmem [shape: f32[8,4], index: 0, kind: input, shape index: {}]   ;;  %s262_s1 = inlined_call_operand.hbm [shape: f32[4,512], index: 1, kind: input, shape index: {}]   ;;  %s263_s2 = inlined_call_operand.vmem [shape: f32[1,512], index: 2, kind: input, shape index: {}]   ;;  %s264_s3 = inlined_call_operand.hbm [shape: f32[8,512], index: 3, kind: output, shape index: {}]  }
   0x1   :  { %9 = vsyncpa [#allocation4], 0  ;;  %s17_s14 = sshll.u32 %s262_s1, 4  ;;  %s227_s15 = smov [#allocation2]   ;;  %s18_s14 = int_to_ptr.hbm [resolvable:$true] %s17_s14 }
   0x2   :  { %s19_s16 = sshll.u32 %s227_s15, 4  ;;  %s20_s16 = int_to_ptr.vmem [resolvable:$true] %s19_s16 }
   0x3   :  { %22 = dma.hbm_to_vmem [thread:$0]  %s18_s14, 256, %s20_s16, [#allocation3]  }
   0x4   :  { %223 = dma.done.wait [#allocation3], 256  }
   0x5   :  { %224 = vsyncadd [#allocation3], 4294967040  ;;  %v31_v0 = vld [vmem:[#allocation2 + $0x8] sm:$0xff]  ;;  %v30_v1 = vld [vmem:[#allocation2] sm:$0xff]  ;;  %vm55_vm0 = vcmask 1043456   ;;  %vm51_vm1 = vcmask 31744  }
   0x6   :  { %46 = vst [vmem:[#allocation1 + $0x10] ss:$2 sm:$0xff] %v31_v0  ;;  %v29_v2 = vld [vmem:[%s261_s0] sm:$0xff]  ;;  %s228_s0 = smov [#allocation5]   ;;  %s155_s23 = sshll.u32 %s264_s3, 4  ;;  %s156_s23 = int_to_ptr.hbm [resolvable:$true] %s155_s23 }
   0x7   :  { %44 = vst [vmem:[#allocation1] ss:$2 sm:$0xff] %v30_v1  ;;  %v32_v7 = vld [vmem:[%s263_s2] sm:$0xf]  ;;  %s153_s20 = sshll.u32 %s228_s0, 4  ;;  %s154_s20 = int_to_ptr.vmem [resolvable:$true] %s153_s20 }
   0x8   :  { %v34_v8 = vperm.slane %v32_v7, 0  ;;  %v35_v9 = vperm.slane %v32_v7, 1  ;;  %v36_v14 = vperm.slane %v32_v7, 2  ;;  %v37_v15 = vperm.slane %v32_v7, 3 }
   0xd   :  { %v49_v3 = vld.sshfl [vmem:[#allocation1 + $0x10] sm:$0xff pattern:$0x75316420]  ;;  %v50_v4 = vld.sshfl [vmem:[#allocation1 + $0x18] sm:$0xff pattern:$0x75316420] }
   0xe   :  { %169 = vmatpush.msk.msra.mxu2 %vm55_vm0, %v49_v3  ;;  %171 = vmatpush.msk.msra.mxu3 %vm55_vm0, %v50_v4  ;;  %v47_v5 = vld.sshfl [vmem:[#allocation1] sm:$0xff pattern:$0x75316420]  ;;  %v48_v6 = vld.sshfl [vmem:[#allocation1 + $0x8] sm:$0xff pattern:$0x75316420] }
   0xf   :  { %170 = vmatmul.msk.f32.vlgmr.msra.gmra.mxu2 %vm51_vm1, %v29_v2  ;;  %172 = vmatmul.msk.f32.vlgmr.msra.gmra.mxu3 %vm51_vm1, %v29_v2 }
  0x10   :  { %165 = vmatpush.msk.msra.mxu0 %vm55_vm0, %v47_v5  ;;  %167 = vmatpush.msk.msra.mxu1 %vm55_vm0, %v48_v6 }
  0x11   :  { %166 = vmatmul.msk.f32.vlgmr.msra.gmra.mxu0 %vm51_vm1, %v29_v2  ;;  %168 = vmatmul.msk.f32.vlgmr.msra.gmra.mxu1 %vm51_vm1, %v29_v2 }
  0x8e   :  { %v81_v10 = vpop.f32.mrf.mxu0  ;;  %v101_v11 = vpop.f32.mrf.mxu1 }
  0x8f   :  { %v82_v12 = vadd.f32 %v81_v10, %v34_v8  ;;  %v102_v13 = vadd.f32 %v101_v11, %v35_v9 }
  0x91   :  { %144 = vst [vmem:[#allocation5] sm:$0xff] %v82_v12 }
  0x92   :  { %145 = vst [vmem:[#allocation5 + $0x8] sm:$0xff] %v102_v13  ;;  %v121_v16 = vpop.f32.mrf.mxu2  ;;  %v141_v17 = vpop.f32.mrf.mxu3 }
  0x93   :  { %v122_v18 = vadd.f32 %v121_v16, %v36_v14  ;;  %v142_v19 = vadd.f32 %v141_v17, %v37_v15 }
  0x95   :  { %146 = vst [vmem:[#allocation5 + $0x10] sm:$0xff] %v122_v18 }
  0x96   :  { %147 = vst [vmem:[#allocation5 + $0x18] sm:$0xff] %v142_v19 }
  0x97   :  { %158 = dma.vmem_to_hbm [thread:$0]  %s154_s20, 512, %s156_s23, [#allocation4]  }
  0x98   :  { %225 = dma.done.wait [#allocation4], 512  }
  0x99   :  { %226 = vsyncadd [#allocation4], 4294966784 }
  0x9a   :  { %163 = vsyncpa [#allocation3], 1 }
  0x9b   :  { %164 = vsyncpa [#allocation4], 1 }

</bundles_post_ra>
